<compile_context>
chip_gen: v7x
topology: tpu7x:2x2x1
jax: 0.10.0
libtpu: 0.0.40
codegen_flags: <defaults>
</compile_context>

<pallas_src>
import numpy as np
import jax
import jax.numpy as jnp
from jax.experimental import pallas as pl
from jax.experimental.pallas import tpu as pltpu


# ----------------------------- config (small) -----------------------------
N_NODES = 8
EMBEDDING_DIM = 16
CONTEXT_VECTOR_SIZE = 16
HIDDEN_DIM = 32          # hnet_hidden_dim
N_HIDDEN = 3             # hnet_n_hidden -> mlp = L0, ReLU, L1, ReLU, L2, ReLU, L3

# ------------------- packed parameter buffer layout ------------------------
# One f32 buffer of shape (PACK_ROWS, PACK_COLS) = (112, 32).  All row offsets
# are multiples of 8 (sublane aligned); every block is PACK_COLS lanes wide.
PACK_COLS = HIDDEN_DIM                       # 32 lanes
HEAD_COLS = CONTEXT_VECTOR_SIZE + 1          # 17: [fc1.weight row | fc1.bias]
W0P_ROW = 0                                  # rows   0..7   : W0' = emb @ w0        (8, 32)
W1_ROW = 8                                   # rows   8..39  : w1                    (32, 32)
W2_ROW = 40                                  # rows  40..71  : w2                    (32, 32)
W3H_ROW = 72                                 # rows  72..103 : W3h = w3 @ [wf|wb]    (32, 17), cols>=17 zero
BIAS_ROW = 104                               # rows 104..111 : row0=b0 row1=b1 row2=b2 row3=b3h (cols>=17 zero)
PACK_ROWS = 112

MAX_TILE_M = 512                             # batch tile (rows) for the 1-D grid


# ------------------------------ Pallas kernel ------------------------------
def lrhyper_kernel(idx_ref, p_ref, out_ref):
    """Per grid step:
       idx_ref: (TM, 1) int32 node indices
       p_ref:   (112, 32) f32 packed (pre-folded) parameters, resident in VMEM
       out_ref: (TM, 32) f32 -> cols 0..15 = fc1.weight row, col 16 = fc1.bias
    """
    tm = out_ref.shape[0]

    # All biases in one aligned (8, 32) f32 block (rows 4..7 unused).
    b_all = p_ref[BIAS_ROW:BIAS_ROW + 8, :]

    # Embedding lookup + L0 fused: one-hot (TM, 8) @ W0' (8, 32).
    # NOTE: out-of-range idx gives an all-zero one-hot row (bias-only output)
    # instead of raising like torch.nn.Embedding; callers must pass valid idx.
    node_iota = jax.lax.broadcasted_iota(jnp.int32, (tm, N_NODES), 1)
    onehot = (idx_ref[...] == node_iota).astype(jnp.bfloat16)
    w0p = p_ref[W0P_ROW:W0P_ROW + N_NODES, :].astype(jnp.bfloat16)
    h = jnp.dot(onehot, w0p, preferred_element_type=jnp.float32) + b_all[0, :]
    h = jnp.maximum(h, 0.0)

    # L1, ReLU
    w1 = p_ref[W1_ROW:W1_ROW + HIDDEN_DIM, :].astype(jnp.bfloat16)
    h = jnp.dot(h.astype(jnp.bfloat16), w1, preferred_element_type=jnp.float32) + b_all[1, :]
    h = jnp.maximum(h, 0.0)

    # L2, ReLU
    w2 = p_ref[W2_ROW:W2_ROW + HIDDEN_DIM, :].astype(jnp.bfloat16)
    h = jnp.dot(h.astype(jnp.bfloat16), w2, preferred_element_type=jnp.float32) + b_all[2, :]
    h = jnp.maximum(h, 0.0)

    # L3 + fused head, folded: (TM, 32) @ (32, 17-padded-to-32).
    w3h = p_ref[W3H_ROW:W3H_ROW + HIDDEN_DIM, :].astype(jnp.bfloat16)
    out_ref[...] = (jnp.dot(h.astype(jnp.bfloat16), w3h,
                            preferred_element_type=jnp.float32) + b_all[3, :])


# ------------------------------ wrapper ------------------------------------
@jax.jit
def lrhyper_forward(idx, packed):
    """idx: int32 array of node indices, shape (M,) (M >= 1).
    Returns {'fc1.weight': (M, C), 'fc1.bias': (M,)}.
    For a single index (M=1) this matches the PyTorch module: (1, C) and (1,)."""
    idx = jnp.asarray(idx, jnp.int32).reshape(-1)
    m = idx.shape[0]

    # Pick a batch tile: whole (8-padded) batch for small M, 512-row tiles otherwise.
    if m <= MAX_TILE_M:
        tm = max(8, ((m + 7) // 8) * 8)
    else:
        tm = MAX_TILE_M
    m_pad = ((m + tm - 1) // tm) * tm

    if m_pad == m:
        idx_col = idx.reshape(m, 1)                               # no pad / scatter needed
    else:
        idx_col = jnp.zeros((m_pad, 1), jnp.int32).at[:m, 0].set(idx)  # pad rows use node 0

    out = pl.pallas_call(
        lrhyper_kernel,
        out_shape=jax.ShapeDtypeStruct((m_pad, PACK_COLS), jnp.float32),
        grid=(m_pad // tm,),
        in_specs=[
            pl.BlockSpec((tm, 1), lambda i: (i, 0)),                       # idx tile
            pl.BlockSpec((PACK_ROWS, PACK_COLS), lambda i: (0, 0)),        # params: resident
        ],
        out_specs=pl.BlockSpec((tm, PACK_COLS), lambda i: (i, 0)),
        compiler_params=pltpu.CompilerParams(
            dimension_semantics=("parallel",)),                            # 2 TCs on v7x
    )(idx_col, packed)

    return {"fc1.weight": out[:m, :CONTEXT_VECTOR_SIZE],
            "fc1.bias": out[:m, CONTEXT_VECTOR_SIZE]}


# ---------------------- deterministic parameter init -----------------------
def init_params(key):
    ks = jax.random.split(key, 13)

    def lin(kw, kb, fan_in, fan_out):
        # stored as (in, out): transpose of torch's (out, in)
        w = jax.random.normal(kw, (fan_in, fan_out), jnp.float32) / np.sqrt(fan_in)
        b = jax.random.normal(kb, (1, fan_out), jnp.float32) * 0.1
        return w, b

    p = {"emb": jax.random.normal(ks[0], (N_NODES, EMBEDDING_DIM), jnp.float32)}
    p["w0"], p["b0"] = lin(ks[1], ks[2], EMBEDDING_DIM, HIDDEN_DIM)
    p["w1"], p["b1"] = lin(ks[3], ks[4], HIDDEN_DIM, HIDDEN_DIM)
    p["w2"], p["b2"] = lin(ks[5], ks[6], HIDDEN_DIM, HIDDEN_DIM)
    p["w3"], p["b3"] = lin(ks[7], ks[8], HIDDEN_DIM, HIDDEN_DIM)
    p["wf"], p["bf"] = lin(ks[9], ks[10], HIDDEN_DIM, CONTEXT_VECTOR_SIZE)
    p["wb"], p["bb"] = lin(ks[11], ks[12], HIDDEN_DIM, 1)
    return p


def pack_params(p):
    """Pack the network into one (112, 32) f32 buffer with the emb@w0 and
    w3@[wf|wb] folds precomputed (in f64 for accuracy, then cast to f32)."""
    f64 = lambda a: np.asarray(a, np.float64)
    buf = np.zeros((PACK_ROWS, PACK_COLS), np.float64)

    # FOLD 1: W0' = emb @ w0  (8, 32)
    buf[W0P_ROW:W0P_ROW + N_NODES, :] = f64(p["emb"]) @ f64(p["w0"])
    buf[W1_ROW:W1_ROW + HIDDEN_DIM, :] = f64(p["w1"])
    buf[W2_ROW:W2_ROW + HIDDEN_DIM, :] = f64(p["w2"])

    # FOLD 2: fused head wh = [wf | wb] (32, 17); W3h = w3 @ wh, b3h = b3 @ wh + [bf|bb]
    wh = np.concatenate([f64(p["wf"]), f64(p["wb"])], axis=1)          # (32, 17)
    bh = np.concatenate([f64(p["bf"]), f64(p["bb"])], axis=1)          # (1, 17)
    buf[W3H_ROW:W3H_ROW + HIDDEN_DIM, :HEAD_COLS] = f64(p["w3"]) @ wh

    buf[BIAS_ROW + 0, :] = f64(p["b0"])[0]
    buf[BIAS_ROW + 1, :] = f64(p["b1"])[0]
    buf[BIAS_ROW + 2, :] = f64(p["b2"])[0]
    buf[BIAS_ROW + 3, :HEAD_COLS] = (f64(p["b3"]) @ wh + bh)[0]
    return jnp.asarray(buf.astype(np.float32))


# ------------------- references (correctness checks) -----------------------
def lrhyper_reference(idx, p):
    """float64 reference of the ORIGINAL (unfolded, f32-math) module."""
    f = lambda a: np.asarray(a, np.float64)
    x = f(p["emb"])[np.asarray(idx)]
    h = np.maximum(x @ f(p["w0"]) + f(p["b0"]), 0.0)
    h = np.maximum(h @ f(p["w1"]) + f(p["b1"]), 0.0)
    h = np.maximum(h @ f(p["w2"]) + f(p["b2"]), 0.0)
    h = h @ f(p["w3"]) + f(p["b3"])
    return {"fc1.weight": h @ f(p["wf"]) + f(p["bf"]),
            "fc1.bias": (h @ f(p["wb"]) + f(p["bb"]))[:, 0]}


def lrhyper_packed_ref(idx, packed):
    """Plain-XLA replica of the kernel's exact math (bf16 MXU inputs, f32 acc),
    built from the same packed buffer.  Used to validate the Pallas machinery
    with a tight tolerance, independent of the bf16 vs f64 model error."""
    idx = jnp.asarray(idx, jnp.int32).reshape(-1, 1)
    b = packed[BIAS_ROW:BIAS_ROW + 8, :]
    onehot = (idx == jnp.arange(N_NODES, dtype=jnp.int32)[None, :]).astype(jnp.bfloat16)
    w0p = packed[W0P_ROW:W0P_ROW + N_NODES, :].astype(jnp.bfloat16)
    h = jnp.maximum(jnp.dot(onehot, w0p, preferred_element_type=jnp.float32) + b[0], 0.0)
    w1 = packed[W1_ROW:W1_ROW + HIDDEN_DIM, :].astype(jnp.bfloat16)
    h = jnp.maximum(jnp.dot(h.astype(jnp.bfloat16), w1,
                            preferred_element_type=jnp.float32) + b[1], 0.0)
    w2 = packed[W2_ROW:W2_ROW + HIDDEN_DIM, :].astype(jnp.bfloat16)
    h = jnp.maximum(jnp.dot(h.astype(jnp.bfloat16), w2,
                            preferred_element_type=jnp.float32) + b[2], 0.0)
    w3h = packed[W3H_ROW:W3H_ROW + HIDDEN_DIM, :].astype(jnp.bfloat16)
    out = jnp.dot(h.astype(jnp.bfloat16), w3h, preferred_element_type=jnp.float32) + b[3]
    return {"fc1.weight": out[:, :CONTEXT_VECTOR_SIZE],
            "fc1.bias": out[:, CONTEXT_VECTOR_SIZE]}


if __name__ == "__main__":
    key = jax.random.PRNGKey(0)
    params = init_params(key)
    packed = pack_params(params)

    # --- batched over all 8 node indices (fills the sublane dimension) -----
    idx_all = jnp.arange(N_NODES, dtype=jnp.int32)
    out = lrhyper_forward(idx_all, packed)
    jax.block_until_ready(out)

    # (a) kernel vs. an XLA replica of the exact same bf16/f32 math (tight).
    xref = lrhyper_packed_ref(idx_all, packed)
    np.testing.assert_allclose(np.asarray(out["fc1.weight"]),
                               np.asarray(xref["fc1.weight"]), rtol=1e-4, atol=1e-4)
    np.testing.assert_allclose(np.asarray(out["fc1.bias"]),
                               np.asarray(xref["fc1.bias"]), rtol=1e-4, atol=1e-4)

    # (b) kernel vs. f64 reference of the original module (bf16-level tolerance).
    ref = lrhyper_reference(np.arange(N_NODES), params)
    np.testing.assert_allclose(np.asarray(out["fc1.weight"]), ref["fc1.weight"],
                               rtol=3e-2, atol=3e-2)
    np.testing.assert_allclose(np.asarray(out["fc1.bias"]), ref["fc1.bias"],
                               rtol=3e-2, atol=3e-2)

    # --- larger batch exercising the 1-D grid (3 tiles of 512 rows) --------
    big_idx = jax.random.randint(jax.random.PRNGKey(1), (1536,), 0, N_NODES, jnp.int32)
    big = lrhyper_forward(big_idx, packed)
    jax.block_until_ready(big)
    ref_big = lrhyper_reference(np.asarray(big_idx), params)
    np.testing.assert_allclose(np.asarray(big["fc1.weight"]), ref_big["fc1.weight"],
                               rtol=3e-2, atol=3e-2)
    np.testing.assert_allclose(np.asarray(big["fc1.bias"]), ref_big["fc1.bias"],
                               rtol=3e-2, atol=3e-2)

    # --- single-index call: matches the PyTorch module's forward(idx) ------
    single = lrhyper_forward(jnp.array([3], dtype=jnp.int32), packed)
    jax.block_until_ready(single)
    assert single["fc1.weight"].shape == (1, CONTEXT_VECTOR_SIZE)
    assert single["fc1.bias"].shape == (1,)
    np.testing.assert_allclose(np.asarray(single["fc1.weight"]), ref["fc1.weight"][3:4],
                               rtol=3e-2, atol=3e-2)
    np.testing.assert_allclose(np.asarray(single["fc1.bias"]), ref["fc1.bias"][3:4],
                               rtol=3e-2, atol=3e-2)

    print("KERNEL_OK")
</pallas_src>

<mosaic_0001>
module attributes {stable_mosaic.version = 11 : i64} {
  func.func @lrhyper_kernel(%arg0: i32, %arg1: memref<8x1xi32, #tpu.memory_space<vmem>>, %arg2: memref<112x32xf32, #tpu.memory_space<vmem>>, %arg3: memref<8x32xf32, #tpu.memory_space<vmem>>) attributes {dimension_semantics = [#tpu.dimension_semantics<parallel>], iteration_bounds = array<i64: 1>, scalar_prefetch = 0 : i64, scratch_operands = 0 : i64, tpu.core_type = #tpu.core_type<tc>, window_params = [{transform_indices = @transform_0, window_bounds = array<i64: 8, 1>}, {pipeline_mode = #tpu.pipeline_mode<synchronous>, transform_indices = @transform_1, window_bounds = array<i64: 112, 32>}, {transform_indices = @transform_2, window_bounds = array<i64: 8, 32>}]} {
    %c104 = arith.constant 104 : index
    %c0 = arith.constant 0 : index
    %0 = vector.load %arg2[%c104, %c0] : memref<112x32xf32, #tpu.memory_space<vmem>>, vector<8x32xf32>
    %1 = tpu.iota {dimensions = array<i32: 1>} : vector<8x8xi32>
    %c0_0 = arith.constant 0 : index
    %c0_1 = arith.constant 0 : index
    %2 = vector.load %arg1[%c0_0, %c0_1] : memref<8x1xi32, #tpu.memory_space<vmem>>, vector<8x1xi32>
    %3 = vector.broadcast %2 : vector<8x1xi32> to vector<8x8xi32>
    %4 = arith.cmpi eq, %3, %1 : vector<8x8xi32>
    %5 = arith.extui %4 : vector<8x8xi1> to vector<8x8xi32>
    %6 = arith.sitofp %5 : vector<8x8xi32> to vector<8x8xf32>
    %7 = arith.truncf %6 : vector<8x8xf32> to vector<8x8xbf16>
    %c0_2 = arith.constant 0 : index
    %c0_3 = arith.constant 0 : index
    %8 = vector.load %arg2[%c0_2, %c0_3] : memref<112x32xf32, #tpu.memory_space<vmem>>, vector<8x32xf32>
    %9 = arith.truncf %8 : vector<8x32xf32> to vector<8x32xbf16>
    %cst = arith.constant dense<0.000000e+00> : vector<8x32xf32>
    %10 = tpu.matmul %7, %9, %cst {dimension_numbers = #tpu.dot_dimension_numbers<[1], [0], [0], [1], [0, 0, 1, 1], [], []>} : vector<8x8xbf16>, vector<8x32xbf16>, vector<8x32xf32> -> vector<8x32xf32>
    %11 = vector.extract_strided_slice %0 {offsets = [0, 0], sizes = [1, 32], strides = [1, 1]} : vector<8x32xf32> to vector<1x32xf32>
    %12 = vector.shape_cast %11 : vector<1x32xf32> to vector<32xf32>
    %13 = vector.shape_cast %12 : vector<32xf32> to vector<1x32xf32>
    %14 = vector.broadcast %13 : vector<1x32xf32> to vector<8x32xf32>
    %15 = arith.addf %10, %14 : vector<8x32xf32>
    %cst_4 = arith.constant 0.000000e+00 : f32
    %16 = vector.broadcast %cst_4 : f32 to vector<8x32xf32>
    %17 = arith.maximumf %15, %16 : vector<8x32xf32>
    %c8 = arith.constant 8 : index
    %c0_5 = arith.constant 0 : index
    %18 = vector.load %arg2[%c8, %c0_5] : memref<112x32xf32, #tpu.memory_space<vmem>>, vector<32x32xf32>
    %19 = arith.truncf %18 : vector<32x32xf32> to vector<32x32xbf16>
    %20 = arith.truncf %17 : vector<8x32xf32> to vector<8x32xbf16>
    %cst_6 = arith.constant dense<0.000000e+00> : vector<8x32xf32>
    %21 = tpu.matmul %20, %19, %cst_6 {dimension_numbers = #tpu.dot_dimension_numbers<[1], [0], [0], [1], [0, 0, 1, 1], [], []>} : vector<8x32xbf16>, vector<32x32xbf16>, vector<8x32xf32> -> vector<8x32xf32>
    %22 = vector.extract_strided_slice %0 {offsets = [1, 0], sizes = [1, 32], strides = [1, 1]} : vector<8x32xf32> to vector<1x32xf32>
    %23 = vector.shape_cast %22 : vector<1x32xf32> to vector<32xf32>
    %24 = vector.shape_cast %23 : vector<32xf32> to vector<1x32xf32>
    %25 = vector.broadcast %24 : vector<1x32xf32> to vector<8x32xf32>
    %26 = arith.addf %21, %25 : vector<8x32xf32>
    %cst_7 = arith.constant 0.000000e+00 : f32
    %27 = vector.broadcast %cst_7 : f32 to vector<8x32xf32>
    %28 = arith.maximumf %26, %27 : vector<8x32xf32>
    %c40 = arith.constant 40 : index
    %c0_8 = arith.constant 0 : index
    %29 = vector.load %arg2[%c40, %c0_8] : memref<112x32xf32, #tpu.memory_space<vmem>>, vector<32x32xf32>
    %30 = arith.truncf %29 : vector<32x32xf32> to vector<32x32xbf16>
    %31 = arith.truncf %28 : vector<8x32xf32> to vector<8x32xbf16>
    %cst_9 = arith.constant dense<0.000000e+00> : vector<8x32xf32>
    %32 = tpu.matmul %31, %30, %cst_9 {dimension_numbers = #tpu.dot_dimension_numbers<[1], [0], [0], [1], [0, 0, 1, 1], [], []>} : vector<8x32xbf16>, vector<32x32xbf16>, vector<8x32xf32> -> vector<8x32xf32>
    %33 = vector.extract_strided_slice %0 {offsets = [2, 0], sizes = [1, 32], strides = [1, 1]} : vector<8x32xf32> to vector<1x32xf32>
    %34 = vector.shape_cast %33 : vector<1x32xf32> to vector<32xf32>
    %35 = vector.shape_cast %34 : vector<32xf32> to vector<1x32xf32>
    %36 = vector.broadcast %35 : vector<1x32xf32> to vector<8x32xf32>
    %37 = arith.addf %32, %36 : vector<8x32xf32>
    %cst_10 = arith.constant 0.000000e+00 : f32
    %38 = vector.broadcast %cst_10 : f32 to vector<8x32xf32>
    %39 = arith.maximumf %37, %38 : vector<8x32xf32>
    %c72 = arith.constant 72 : index
    %c0_11 = arith.constant 0 : index
    %40 = vector.load %arg2[%c72, %c0_11] : memref<112x32xf32, #tpu.memory_space<vmem>>, vector<32x32xf32>
    %41 = arith.truncf %40 : vector<32x32xf32> to vector<32x32xbf16>
    %42 = arith.truncf %39 : vector<8x32xf32> to vector<8x32xbf16>
    %cst_12 = arith.constant dense<0.000000e+00> : vector<8x32xf32>
    %43 = tpu.matmul %42, %41, %cst_12 {dimension_numbers = #tpu.dot_dimension_numbers<[1], [0], [0], [1], [0, 0, 1, 1], [], []>} : vector<8x32xbf16>, vector<32x32xbf16>, vector<8x32xf32> -> vector<8x32xf32>
    %44 = vector.extract_strided_slice %0 {offsets = [3, 0], sizes = [1, 32], strides = [1, 1]} : vector<8x32xf32> to vector<1x32xf32>
    %45 = vector.shape_cast %44 : vector<1x32xf32> to vector<32xf32>
    %46 = vector.shape_cast %45 : vector<32xf32> to vector<1x32xf32>
    %47 = vector.broadcast %46 : vector<1x32xf32> to vector<8x32xf32>
    %48 = arith.addf %43, %47 : vector<8x32xf32>
    %c0_13 = arith.constant 0 : index
    %c0_14 = arith.constant 0 : index
    %49 = vector.load %arg3[%c0_13, %c0_14] : memref<8x32xf32, #tpu.memory_space<vmem>>, vector<8x32xf32>
    tpu.vector_store %arg3[%c0_13, %c0_14], %48 {strides = array<i32>} : memref<8x32xf32, #tpu.memory_space<vmem>>, vector<8x32xf32>,
    return
  }
  func.func @transform_0(%arg0: i32) -> (i32, i32) {
    %c0_i32 = arith.constant 0 : i32
    %c0_i32_0 = arith.constant 0 : i32
    return %arg0, %c0_i32 : i32, i32
  }
  func.func @transform_1(%arg0: i32) -> (i32, i32) {
    %c0_i32 = arith.constant 0 : i32
    %c0_i32_0 = arith.constant 0 : i32
    %c0_i32_1 = arith.constant 0 : i32
    return %c0_i32, %c0_i32_0 : i32, i32
  }
  func.func @transform_2(%arg0: i32) -> (i32, i32) {
    %c0_i32 = arith.constant 0 : i32
    %c0_i32_0 = arith.constant 0 : i32
    return %arg0, %c0_i32 : i32, i32
  }
}

</mosaic_0001>

<bundles_post_ra>
// kernel: lrhyper_forward.1
= control target key start
LH: loop header
LB: loop body
LE: loop exit
PB: predicated region body
PF: predicated region fallthrough
CT: control target
= control target key end

     0   :  { %v298_v0 = vmov 0   ;;  %v299_v2 = vmov 0.0   ;;  %vm33_vm0 = vcmask 1043456   ;;  %vm300_vm1 = vmmov 0   ;;  %s372_s0 = inlined_call_operand.vmem [shape: s32[8,1], index: 0, kind: input, shape index: {}]   ;;  %s373_s1 = inlined_call_operand.vmem [shape: f32[112,32], index: 1, kind: input, shape index: {}]   ;;  %s374_s2 = inlined_call_operand.vmem [shape: f32[8,32], index: 2, kind: output, shape index: {}]  }
   0x1   :  { %297 = vset.pattern.permute.xlu0 %v298_v0  ;;  %v15_v1 = vld [vmem:[%s372_s0] sm:$0xff]  ;;  %264 = vmatprep.subr.bf16.mxu0 %v299_v2  ;;  %v13_v6 = vlaneseq  ;;  %vm29_vm3 = vcmask 64512   ;;  %v78_v11 = vld [vmem:[%s373_s1 + $0x8] sm:$0xff]  ;;  %v79_v12 = vld [vmem:[%s373_s1 + $0x10] sm:$0xff]  ;;  %vm89_vm4 = vcmask 261120  }
   0x2   :  { %v23_v3 = vld [vmem:[%s373_s1] sm:$0xff]  ;;  %17 = vperm.xlu0 %297, %v15_v1   ;;  %270 = vmatprep.subr.bf16.mxu1 %v299_v2  ;;  %v82_v13 = vpack.c.bf16 %v79_v12, %v78_v11  ;;  %v80_v14 = vld [vmem:[%s373_s1 + $0x18] sm:$0xff]  ;;  %v134_v17 = vld [vmem:[%s373_s1 + $0x28] sm:$0xff] }
   0x3   :  { %v24_v4 = vpack.c.bf16 %v23_v3, %v23_v3  ;;  %266 = vmatprep.mubr.msk.bf16.mxu0 %vm300_vm1, %v299_v2  ;;  %274 = vmatprep.mubr.msk.bf16.mxu1 %vm300_vm1, %v299_v2  ;;  %v14_v7 = vand.u32 127, %v13_v6  ;;  %v81_v15 = vld [vmem:[%s373_s1 + $0x20] sm:$0xff]  ;;  %v135_v18 = vld [vmem:[%s373_s1 + $0x30] sm:$0xff]  ;;  %v26_v20 = vshrl.u32 %v13_v6, 7  ;;  %v12_v22 = vld [vmem:[%s373_s1 + $0x68] sm:$0xff] }
   0x4   :  { %271 = vmatpush3.bf16.msra.mxu1 %v82_v13  ;;  %v83_v16 = vpack.c.bf16 %v81_v15, %v80_v14  ;;  %v138_v19 = vpack.c.bf16 %v135_v18, %v134_v17  ;;  %v136_v31 = vld [vmem:[%s373_s1 + $0x38] sm:$0xff]  ;;  %v137_v32 = vld [vmem:[%s373_s1 + $0x40] sm:$0xff]  ;;  %v189_v34 = vld [vmem:[%s373_s1 + $0x48] sm:$0xff] }
   0x5   :  { %v35_v5 = vsel %vm33_vm0, %v24_v4, 0  ;;  %272 = vmatprep.subr.bf16.mxu1 %v299_v2  ;;  %v27_v21 = vsub.s32 0, %v26_v20  ;;  %v139_v33 = vpack.c.bf16 %v137_v32, %v136_v31  ;;  %v190_v35 = vld [vmem:[%s373_s1 + $0x50] sm:$0xff]  ;;  %v87_v37 = vsub.s32 1, %v26_v20  ;;  %v191_v46 = vld [vmem:[%s373_s1 + $0x58] sm:$0xff]  ;;  %v192_v47 = vld [vmem:[%s373_s1 + $0x60] sm:$0xff] }
   0x6   :  { %265 = vmatpush3.bf16.msra.mxu0 %v35_v5  ;;  %v193_v36 = vpack.c.bf16 %v190_v35, %v189_v34  ;;  %v194_v48 = vpack.c.bf16 %v192_v47, %v191_v46  ;;  %v143_v49 = vsub.s32 2, %v26_v20  ;;  %v198_v58 = vsub.s32 3, %v26_v20 }
   0x7   :  { %278 = vmatprep.subr.bf16.mxu0 %v299_v2  ;;  %v28_v23 = vrot.slane %v12_v22, %v27_v21  ;;  %v88_v38 = vrot.slane %v12_v22, %v87_v37 }
   0x8   :  { %273 = vmatpush3.bf16.msra.mxu1 %v83_v16  ;;  %v144_v50 = vrot.slane %v12_v22, %v143_v49  ;;  %v199_v59 = vrot.slane %v12_v22, %v198_v58 }
   0x9   :  { %286 = vmatprep.subr.bf16.mxu1 %v299_v2 }
  0x81   :  { %v18_v8 = vpop.permute.xlu0 %17 }
  0x82   :  { %vm19_vm2 = vcmp.eq.s32.totalorder %v18_v8, %v14_v7 }
  0x83   :  { %v248_v9 = vsel %vm19_vm2, 1.0, %v299_v2 }
  0x84   :  { %v22_v10 = vpack.c.bf16 %v248_v9, %v248_v9 }
  0x86   :  { %267 = vmatmul.mubr.msk.bf16.vlgmr.msra.gmra.mrb[0].mxu0 %vm29_vm3, %v22_v10 }
  0x87   :  { %282 = vmatprep.mubr.msk.bf16.mxu0 %vm300_vm1, %v299_v2  ;;  %279 = vmatpush3.bf16.msra.mxu0 %v138_v19 }
  0x88   :  { %280 = vmatprep.subr.bf16.mxu0 %v299_v2 }
  0x8b   :  { %281 = vmatpush3.bf16.msra.mxu0 %v139_v33 }
 0x159   :  { %v71_v24 = vpop.f32.mrb[0].mxu0 }
 0x15a   :  { %v72_v25 = vadd.f32 %v71_v24, %v28_v23  ;;  %v268_v26 = vpop.f32.mrb[1].mxu0 }
 0x15b   :  { %v74_v27 = vpop.f32.mrb[2].mxu0 }
 0x15c   :  { %v77_v28 = vmax.f32 %v72_v25, 0.0  ;;  %v269_v29 = vpop.f32.mrb[3].mxu0 }
 0x15e   :  { %v84_v30 = vpack.c.bf16 %v77_v28, %v77_v28 }
 0x160   :  { %275 = vmatmul.mubr.msk.bf16.vlgmr.msra.gmra.mrb[0].mxu1 %vm89_vm4, %v84_v30 }
 0x161   :  { %290 = vmatprep.mubr.msk.bf16.mxu1 %vm300_vm1, %v299_v2  ;;  %287 = vmatpush3.bf16.msra.mxu1 %v193_v36 }
 0x162   :  { %288 = vmatprep.subr.bf16.mxu1 %v299_v2 }
 0x165   :  { %289 = vmatpush3.bf16.msra.mxu1 %v194_v48 }
 0x233   :  { %v127_v39 = vpop.f32.mrb[0].mxu1 }
 0x234   :  { %v128_v40 = vadd.f32 %v127_v39, %v88_v38  ;;  %v276_v41 = vpop.f32.mrb[1].mxu1 }
 0x235   :  { %v130_v42 = vpop.f32.mrb[2].mxu1 }
 0x236   :  { %v133_v43 = vmax.f32 %v128_v40, 0.0  ;;  %v277_v44 = vpop.f32.mrb[3].mxu1 }
 0x238   :  { %v140_v45 = vpack.c.bf16 %v133_v43, %v133_v43 }
 0x23a   :  { %283 = vmatmul.mubr.msk.bf16.vlgmr.msra.gmra.mrb[4].mxu0 %vm89_vm4, %v140_v45 }
 0x30d   :  { %v182_v51 = vpop.f32.mrb[4].mxu0 }
 0x30e   :  { %v183_v52 = vadd.f32 %v182_v51, %v144_v50  ;;  %v284_v53 = vpop.f32.mrb[5].mxu0 }
 0x30f   :  { %v185_v54 = vpop.f32.mrb[6].mxu0 }
 0x310   :  { %v188_v55 = vmax.f32 %v183_v52, 0.0  ;;  %v285_v56 = vpop.f32.mrb[7].mxu0 }
 0x312   :  { %v195_v57 = vpack.c.bf16 %v188_v55, %v188_v55 }
 0x314   :  { %291 = vmatmul.mubr.msk.bf16.vlgmr.msra.gmra.mrb[4].mxu1 %vm89_vm4, %v195_v57 }
 0x3e7   :  { %v237_v60 = vpop.f32.mrb[4].mxu1 }
 0x3e8   :  { %v238_v61 = vadd.f32 %v237_v60, %v199_v59  ;;  %v292_v62 = vpop.f32.mrb[5].mxu1 }
 0x3e9   :  { %v240_v63 = vpop.f32.mrb[6].mxu1 }
 0x3ea   :  { %243 = vst.msk [vmem:[%s374_s2] sm:$0xff] %vm89_vm4, %v238_v61  ;;  %v293_v0 = vpop.f32.mrb[7].mxu1 }

</bundles_post_ra>
